<compile_context>
chip_gen: v6e
topology: v6e:2x2x1
jax: 0.10.0
libtpu: 0.0.40
codegen_flags: <defaults>
</compile_context>

<pallas_src>
import jax
import jax.numpy as jnp
from jax.experimental import pallas as pl
from jax.experimental.pallas import tpu as pltpu


def _round_up(x, m):
    return (x + m - 1) // m * m


# --------------------------------- kernels ---------------------------------

def hidden_kernel(x_ref, w1_ref, b1_ref, h_ref):
    # x_ref  : (tile_b, CEp) bf16   gathered context embeddings (zero-padded)
    # w1_ref : (CEp, Hp)     bf16   hidden_layer.weight.T (zero-padded)
    # b1_ref : (1, Hp)       f32
    # h_ref  : (tile_b, Hp)  bf16   tanh(x @ W1^T + b1)
    acc = jnp.dot(x_ref[...], w1_ref[...], preferred_element_type=jnp.float32)
    h_ref[...] = jnp.tanh(acc + b1_ref[...]).astype(h_ref.dtype)


def output_kernel(h_ref, w2_ref, b2_ref, o_ref):
    # h_ref  : (tile_b, Hp)     bf16
    # w2_ref : (Hp, tile_v)     bf16   output_layer.weight.T vocab tile
    # b2_ref : (1, tile_v)      f32    vocab tile
    # o_ref  : (tile_b, tile_v) f32    logits vocab tile
    o_ref[...] = (
        jnp.dot(h_ref[...], w2_ref[...], preferred_element_type=jnp.float32)
        + b2_ref[...]
    ).astype(o_ref.dtype)


# --------------------------------- wrapper ---------------------------------

def prepare_params(emb, w1, b1, w2, b2, *, context_size,
                   mxu_dtype=jnp.bfloat16, tile_v_max=1024):
    """One-time parameter prep (transpose / pad / cast). Call once, reuse every forward."""
    V, E = emb.shape
    C = context_size - 1
    H, CE = w1.shape
    assert CE == C * E, (CE, C, E)
    assert w2.shape == (V, H) and b1.shape == (H,) and b2.shape == (V,)

    CEp = _round_up(CE, 128)                       # K of layer 1, lane/sublane aligned
    Hp = _round_up(H, 128)
    tile_v = min(tile_v_max, _round_up(V, 128))
    Vp = _round_up(V, tile_v)

    w1t = jnp.zeros((CEp, Hp), mxu_dtype).at[:CE, :H].set(jnp.asarray(w1, mxu_dtype).T)
    b1p = jnp.zeros((1, Hp), jnp.float32).at[0, :H].set(jnp.asarray(b1, jnp.float32))
    w2t = jnp.zeros((Hp, Vp), mxu_dtype).at[:H, :V].set(jnp.asarray(w2, mxu_dtype).T)
    b2p = jnp.zeros((1, Vp), jnp.float32).at[0, :V].set(jnp.asarray(b2, jnp.float32))
    emb_b = jnp.asarray(emb, mxu_dtype)            # gathered in the wrapper; no V padding

    return {"emb": emb_b, "w1t": w1t, "b1": b1p, "w2t": w2t, "b2": b2p,
            "V": V, "E": E, "C": C, "CE": CE, "CEp": CEp, "Hp": Hp,
            "Vp": Vp, "tile_v": tile_v, "mxu_dtype": mxu_dtype}


def nplm_forward(idx, params):
    """idx: (B, C) int token ids (ids are clamped by the XLA gather); returns (B, V) f32 logits."""
    B, C = idx.shape
    assert C == params["C"], (C, params["C"])
    emb, w1t, b1, w2t, b2 = (params["emb"], params["w1t"], params["b1"],
                             params["w2t"], params["b2"])
    CE, CEp, Hp = params["CE"], params["CEp"], params["Hp"]
    Vp, tile_v = params["Vp"], params["tile_v"]
    mxu_dtype = params["mxu_dtype"]

    # Batch tiling: fill the MXU (128 rows) when the batch is big enough,
    # otherwise pad only to a sublane multiple and use a single batch tile.
    tile_b = min(128, _round_up(B, 8))
    Bp = _round_up(B, tile_b)
    n_b = Bp // tile_b
    n_v = Vp // tile_v
    vmem_limit = 48 * 1024 * 1024                  # fits v7x (64 MiB/TC) with headroom

    # --- embedding gather + (B, C*E) assembly (XLA gather over only B*C rows) ---
    x = emb[idx.astype(jnp.int32)].reshape(B, CE)
    x = jnp.zeros((Bp, CEp), mxu_dtype).at[:B, :CE].set(x.astype(mxu_dtype))

    # --- kernel 1: hidden = tanh(x @ W1^T + b1), computed ONCE, tiled over batch ---
    hidden = pl.pallas_call(
        hidden_kernel,
        out_shape=jax.ShapeDtypeStruct((Bp, Hp), mxu_dtype),
        grid=(n_b,),
        in_specs=[
            pl.BlockSpec((tile_b, CEp), lambda i: (i, 0)),
            pl.BlockSpec((CEp, Hp), lambda i: (0, 0)),
            pl.BlockSpec((1, Hp), lambda i: (0, 0)),
        ],
        out_specs=pl.BlockSpec((tile_b, Hp), lambda i: (i, 0)),
        compiler_params=pltpu.CompilerParams(
            dimension_semantics=("parallel",),
            vmem_limit_bytes=vmem_limit,
        ),
    )(x, w1t, b1)

    # --- kernel 2: logits = hidden @ W2^T + b2, tiled (batch, vocab), both parallel ---
    logits_p = pl.pallas_call(
        output_kernel,
        out_shape=jax.ShapeDtypeStruct((Bp, Vp), jnp.float32),
        grid=(n_b, n_v),
        in_specs=[
            pl.BlockSpec((tile_b, Hp), lambda i, j: (i, 0)),
            pl.BlockSpec((Hp, tile_v), lambda i, j: (0, j)),
            pl.BlockSpec((1, tile_v), lambda i, j: (0, j)),
        ],
        out_specs=pl.BlockSpec((tile_b, tile_v), lambda i, j: (i, j)),
        compiler_params=pltpu.CompilerParams(
            dimension_semantics=("parallel", "parallel"),  # vocab tiles shard across v7x TCs
            vmem_limit_bytes=vmem_limit,
        ),
    )(hidden, w2t, b2)

    return logits_p[:B, :params["V"]]


if __name__ == "__main__":
    # Shapes from the module's constants: NPLM(vocab_size=5000, embedding_dim=100,
    # context_size=5, hidden_dim=128); small batch for the demo.
    batch = 32
    vocab_size = 5000
    embedding_dim = 100
    context_size = 5            # -> C = 4 context words
    hidden_dim = 128
    C = context_size - 1

    key = jax.random.PRNGKey(0)
    k_emb, k_w1, k_b1, k_w2, k_b2, k_idx = jax.random.split(key, 6)

    emb = jax.random.normal(k_emb, (vocab_size, embedding_dim), jnp.float32) * 0.1
    w1 = jax.random.normal(k_w1, (hidden_dim, C * embedding_dim), jnp.float32) * 0.05
    b1 = jax.random.normal(k_b1, (hidden_dim,), jnp.float32) * 0.05
    w2 = jax.random.normal(k_w2, (vocab_size, hidden_dim), jnp.float32) * 0.05
    b2 = jax.random.normal(k_b2, (vocab_size,), jnp.float32) * 0.05
    idx = jax.random.randint(k_idx, (batch, C), 0, vocab_size, jnp.int32)

    params = prepare_params(emb, w1, b1, w2, b2, context_size=context_size)
    logits = jax.block_until_ready(nplm_forward(idx, params))

    # Pure-JAX (f32) reference of the PyTorch forward pass
    x_ref = emb[idx].reshape(batch, -1)
    h_ref = jnp.tanh(x_ref @ w1.T + b1)
    ref = h_ref @ w2.T + b2

    assert logits.shape == (batch, vocab_size), logits.shape
    max_err = float(jnp.max(jnp.abs(logits - ref)))
    assert jnp.allclose(logits, ref, atol=2e-2, rtol=2e-2), max_err
    print("KERNEL_OK")
</pallas_src>

<mosaic_0001>
module attributes {stable_mosaic.version = 11 : i64} {
  func.func @hidden_kernel(%arg0: i32, %arg1: memref<32x512xbf16, #tpu.memory_space<vmem>>, %arg2: memref<512x128xbf16, #tpu.memory_space<vmem>>, %arg3: memref<1x128xf32, #tpu.memory_space<vmem>>, %arg4: memref<32x128xbf16, #tpu.memory_space<vmem>>) attributes {dimension_semantics = [#tpu.dimension_semantics<parallel>], iteration_bounds = array<i64: 1>, scalar_prefetch = 0 : i64, scratch_operands = 0 : i64, tpu.core_type = #tpu.core_type<tc>, window_params = [{transform_indices = @transform_0, window_bounds = array<i64: 32, 512>}, {pipeline_mode = #tpu.pipeline_mode<synchronous>, transform_indices = @transform_1, window_bounds = array<i64: 512, 128>}, {pipeline_mode = #tpu.pipeline_mode<synchronous>, transform_indices = @transform_2, window_bounds = array<i64: 1, 128>}, {transform_indices = @transform_3, window_bounds = array<i64: 32, 128>}]} {
    %c0 = arith.constant 0 : index
    %c0_0 = arith.constant 0 : index
    %0 = vector.load %arg1[%c0, %c0_0] : memref<32x512xbf16, #tpu.memory_space<vmem>>, vector<32x512xbf16>
    %c0_1 = arith.constant 0 : index
    %c0_2 = arith.constant 0 : index
    %1 = vector.load %arg2[%c0_1, %c0_2] : memref<512x128xbf16, #tpu.memory_space<vmem>>, vector<512x128xbf16>
    %cst = arith.constant dense<0.000000e+00> : vector<32x128xf32>
    %2 = tpu.matmul %0, %1, %cst {dimension_numbers = #tpu.dot_dimension_numbers<[1], [0], [0], [1], [0, 0, 1, 1], [], []>} : vector<32x512xbf16>, vector<512x128xbf16>, vector<32x128xf32> -> vector<32x128xf32>
    %c0_3 = arith.constant 0 : index
    %c0_4 = arith.constant 0 : index
    %3 = vector.load %arg3[%c0_3, %c0_4] : memref<1x128xf32, #tpu.memory_space<vmem>>, vector<1x128xf32>
    %4 = vector.broadcast %3 : vector<1x128xf32> to vector<32x128xf32>
    %5 = arith.addf %2, %4 : vector<32x128xf32>
    %6 = math.tanh %5 : vector<32x128xf32>
    %7 = arith.truncf %6 : vector<32x128xf32> to vector<32x128xbf16>
    %c0_5 = arith.constant 0 : index
    %c0_6 = arith.constant 0 : index
    %8 = vector.load %arg4[%c0_5, %c0_6] : memref<32x128xbf16, #tpu.memory_space<vmem>>, vector<32x128xbf16>
    tpu.vector_store %arg4[%c0_5, %c0_6], %7 {strides = array<i32>} : memref<32x128xbf16, #tpu.memory_space<vmem>>, vector<32x128xbf16>,
    return
  }
  func.func @transform_0(%arg0: i32) -> (i32, i32) {
    %c0_i32 = arith.constant 0 : i32
    %c0_i32_0 = arith.constant 0 : i32
    return %arg0, %c0_i32 : i32, i32
  }
  func.func @transform_1(%arg0: i32) -> (i32, i32) {
    %c0_i32 = arith.constant 0 : i32
    %c0_i32_0 = arith.constant 0 : i32
    %c0_i32_1 = arith.constant 0 : i32
    return %c0_i32, %c0_i32_0 : i32, i32
  }
  func.func @transform_2(%arg0: i32) -> (i32, i32) {
    %c0_i32 = arith.constant 0 : i32
    %c0_i32_0 = arith.constant 0 : i32
    %c0_i32_1 = arith.constant 0 : i32
    return %c0_i32, %c0_i32_0 : i32, i32
  }
  func.func @transform_3(%arg0: i32) -> (i32, i32) {
    %c0_i32 = arith.constant 0 : i32
    %c0_i32_0 = arith.constant 0 : i32
    return %arg0, %c0_i32 : i32, i32
  }
}

</mosaic_0001>

<bundles_post_ra>
// kernel: tpu_custom_call.1
= control target key start
LH: loop header
LB: loop body
LE: loop exit
PB: predicated region body
PF: predicated region fallthrough
CT: control target
= control target key end

     0   :  { %8 = vsyncpa [#allocation3], 0  ;;  %s781_s0 = inlined_call_operand.hbm [shape: bf16[32,512], index: 0, kind: input, shape index: {}]   ;;  %s782_s1 = inlined_call_operand.hbm [shape: bf16[512,128], index: 1, kind: input, shape index: {}]   ;;  %s783_s2 = inlined_call_operand.vmem [shape: f32[1,128], index: 2, kind: input, shape index: {}]   ;;  %s784_s3 = inlined_call_operand.hbm [shape: bf16[32,128], index: 3, kind: output, shape index: {}]  }
   0x1   :  { %9 = vsyncpa [#allocation6], 0 }
   0x2   :  { %10 = vsyncpa [#allocation4], 0  ;;  %s736_s12 = smov [#allocation2]  }
   0x3   :  { %s16_s13 = sshll.u32 %s736_s12, 4  ;;  %s17_s13 = int_to_ptr.vmem [resolvable:$true] %s16_s13 }
   0x4   :  { %s678_s14 = scalar_lea.vmem %s17_s13, 1024  ;;  %p683_p1 = scmp.lt.s32.totalorder %s17_s13, %s17_s13 }
   0x5   :  { %p679_p0 = scmp.ne.s32.totalorder %s17_s13, %s678_s14  ;;  %p684_p2 = scmp.lt.s32.totalorder %s678_s14, %s678_s14 }
   0x7   :  { %p685_p3 = por %p684_p2, %p683_p1 }
   0x9   :  { %p686_p4 = pnand %p685_p3, %p679_p0 }
   0xb   :  { %689 = shalt.err (!%p686_p4)
}
   0xc   :  { %s737_s15 = smov 256   ;;  %s738_s16 = smov 16  }
   0xd   :  { %22 = dma.hbm_to_vmem [thread:$0]  %s781_s0, 1024, %s17_s13, [#allocation3], %s737_s15, %s737_s15, %s738_s16  }
   0xe   :  { %s739_s19 = smov [#allocation5]  }
   0xf   :  { %s28_s20 = sshll.u32 %s739_s19, 4  ;;  %s29_s20 = int_to_ptr.vmem [resolvable:$true] %s28_s20 }
  0x10   :  { %s698_s21 = scalar_lea.vmem %s29_s20, 4096  ;;  %p703_p6 = scmp.lt.s32.totalorder %s29_s20, %s29_s20 }
  0x11   :  { %p699_p5 = scmp.ne.s32.totalorder %s29_s20, %s698_s21  ;;  %p704_p7 = scmp.lt.s32.totalorder %s698_s21, %s698_s21 }
  0x13   :  { %p705_p8 = por %p704_p7, %p703_p6 }
  0x15   :  { %p706_p9 = pnand %p705_p8, %p699_p5 }
  0x17   :  { %709 = shalt.err (!%p706_p9)
}
  0x18   :  { %s740_s22 = smov 64   ;;  %s741_s23 = smov 4  }
  0x19   :  { %34 = dma.hbm_to_vmem [thread:$0]  %s782_s1, 4096, %s29_s20, [#allocation6], %s740_s22, %s740_s22, %s741_s23  }
  0x1a   :  { %730 = dma.done.wait [#allocation3], 1024  }
  0x1b   :  { %731 = vsyncadd [#allocation3], 4294966272 }
  0x1c   :  { %732 = dma.done.wait [#allocation6], 4096  }
  0x1d   :  { %733 = vsyncadd [#allocation6], 4294963200  ;;  %v618_v0 = vld [vmem:[#allocation5 + $0x78] sm:$0xff]   ;;  %v622_v4 = vld [vmem:[#allocation5 + $0x70] sm:$0xff]  }
  0x1e   :  { %v619_v1 = vld [vmem:[#allocation5 + $0xf8] sm:$0xff]   ;;  %555 = vmatprep.subr.bf16.mxu0 %v618_v0  ;;  %v623_v5 = vld [vmem:[#allocation5 + $0xf0] sm:$0xff]   ;;  %v626_v8 = vld [vmem:[#allocation5 + $0x68] sm:$0xff]  }
  0x1f   :  { %v620_v2 = vld [vmem:[#allocation5 + $0x38] sm:$0xff]   ;;  %583 = vmatprep.subr.bf16.mxu1 %v619_v1  ;;  %v624_v6 = vld [vmem:[#allocation5 + $0x30] sm:$0xff]   ;;  %v627_v9 = vld [vmem:[#allocation5 + $0xe8] sm:$0xff]  }
  0x20   :  { %v621_v3 = vld [vmem:[#allocation5 + $0xb8] sm:$0xff]   ;;  %556 = vmatpush3.bf16.msra.mxu0 %v620_v2  ;;  %v625_v7 = vld [vmem:[#allocation5 + $0xb0] sm:$0xff]   ;;  %v628_v10 = vld [vmem:[#allocation5 + $0x28] sm:$0xff]  }
  0x21   :  { %584 = vmatpush3.bf16.msra.mxu1 %v621_v3  ;;  %557 = vmatprep.subr.bf16.mxu0 %v622_v4  ;;  %v629_v11 = vld [vmem:[#allocation5 + $0xa8] sm:$0xff]   ;;  %v630_v12 = vld [vmem:[#allocation5 + $0x60] sm:$0xff]   ;;  %v634_v16 = vld [vmem:[#allocation5 + $0x58] sm:$0xff]  }
  0x22   :  { %585 = vmatprep.subr.bf16.mxu1 %v623_v5  ;;  %v631_v13 = vld [vmem:[#allocation5 + $0xe0] sm:$0xff]   ;;  %v635_v17 = vld [vmem:[#allocation5 + $0xd8] sm:$0xff]   ;;  %v638_v20 = vld [vmem:[#allocation5 + $0x50] sm:$0xff]  }
  0x23   :  { %v632_v14 = vld [vmem:[#allocation5 + $0x20] sm:$0xff]   ;;  %v636_v18 = vld [vmem:[#allocation5 + $0x18] sm:$0xff]   ;;  %v639_v21 = vld [vmem:[#allocation5 + $0xd0] sm:$0xff]  }
  0x24   :  { %558 = vmatpush3.bf16.msra.mxu0 %v624_v6  ;;  %v633_v15 = vld [vmem:[#allocation5 + $0xa0] sm:$0xff]   ;;  %v637_v19 = vld [vmem:[#allocation5 + $0x98] sm:$0xff]   ;;  %v640_v22 = vld [vmem:[#allocation5 + $0x10] sm:$0xff]  }
  0x25   :  { %586 = vmatpush3.bf16.msra.mxu1 %v625_v7  ;;  %559 = vmatprep.subr.bf16.mxu0 %v626_v8  ;;  %v641_v23 = vld [vmem:[#allocation5 + $0x90] sm:$0xff]   ;;  %v642_v24 = vld [vmem:[#allocation5 + $0x48] sm:$0xff]   ;;  %v646_v28 = vld [vmem:[#allocation5 + $0x40] sm:$0xff]  }
  0x26   :  { %587 = vmatprep.subr.bf16.mxu1 %v627_v9  ;;  %v643_v25 = vld [vmem:[#allocation5 + $0xc8] sm:$0xff]   ;;  %v647_v29 = vld [vmem:[#allocation5 + $0xc0] sm:$0xff]  }
  0x27   :  { %v644_v26 = vld [vmem:[#allocation5 + $0x8] sm:$0xff]   ;;  %v648_v30 = vld [vmem:[#allocation5] sm:$0xff]  }
  0x28   :  { %560 = vmatpush3.bf16.msra.mxu0 %v628_v10  ;;  %v645_v27 = vld [vmem:[#allocation5 + $0x88] sm:$0xff]   ;;  %v649_v31 = vld [vmem:[#allocation5 + $0x80] sm:$0xff]  }
  0x29   :  { %588 = vmatpush3.bf16.msra.mxu1 %v629_v11  ;;  %561 = vmatprep.subr.bf16.mxu0 %v630_v12  ;;  %v650_v32 = vld [vmem:[#allocation2] ss:$16 sps:$4 sm:$0xff]   ;;  %v652_v33 = vld [vmem:[#allocation2 + $0x4] ss:$16 sps:$4 sm:$0xff]   ;;  %v653_v34 = vld [vmem:[#allocation2 + $0x8] ss:$16 sps:$4 sm:$0xff]  }
  0x2a   :  { %589 = vmatprep.subr.bf16.mxu1 %v631_v13  ;;  %v655_v35 = vld [vmem:[#allocation2 + $0xc] ss:$16 sps:$4 sm:$0xff]   ;;  %387 = vmatprep.mubr.bf16.mxu0 %v652_v33  ;;  %v656_v36 = vld [vmem:[#allocation2 + $0x24] ss:$16 sps:$4 sm:$0xff]   ;;  %v660_v38 = vld [vmem:[#allocation2 + $0x20] ss:$16 sps:$4 sm:$0xff]  }
  0x2b   :  { %436 = vmatprep.mubr.bf16.mxu1 %v655_v35  ;;  %v658_v37 = vld [vmem:[#allocation2 + $0x2c] ss:$16 sps:$4 sm:$0xff]   ;;  %v661_v39 = vld [vmem:[#allocation2 + $0x28] ss:$16 sps:$4 sm:$0xff]   ;;  %v495_v42 = vld [vmem:[%s783_s2] ss:$0 sm:$0xff] }
  0x2c   :  { %562 = vmatpush3.bf16.msra.mxu0 %v632_v14  ;;  %s742_s2 = smov [#allocation7]  }
  0x2d   :  { %590 = vmatpush3.bf16.msra.mxu1 %v633_v15  ;;  %563 = vmatprep.subr.bf16.mxu0 %v634_v16  ;;  %s482_s26 = sshll.u32 %s742_s2, 4  ;;  %s483_s26 = int_to_ptr.vmem [resolvable:$true] %s482_s26 }
  0x2e   :  { %591 = vmatprep.subr.bf16.mxu1 %v635_v17  ;;  %s710_s27 = scalar_lea.vmem %s483_s26, 256  ;;  %p715_p11 = scmp.lt.s32.totalorder %s483_s26, %s483_s26 }
  0x2f   :  { %p711_p10 = scmp.ne.s32.totalorder %s483_s26, %s710_s27  ;;  %p716_p12 = scmp.lt.s32.totalorder %s710_s27, %s710_s27 }
  0x30   :  { %564 = vmatpush3.bf16.msra.mxu0 %v636_v18 }
  0x31   :  { %592 = vmatpush3.bf16.msra.mxu1 %v637_v19  ;;  %565 = vmatprep.subr.bf16.mxu0 %v638_v20  ;;  %p717_p13 = por %p716_p12, %p715_p11 }
  0x32   :  { %593 = vmatprep.subr.bf16.mxu1 %v639_v21 }
  0x33   :  { %p718_p0 = pnand %p717_p13, %p711_p10 }
  0x34   :  { %566 = vmatpush3.bf16.msra.mxu0 %v640_v22 }
  0x35   :  { %594 = vmatpush3.bf16.msra.mxu1 %v641_v23  ;;  %567 = vmatprep.subr.bf16.mxu0 %v642_v24 }
  0x36   :  { %595 = vmatprep.subr.bf16.mxu1 %v643_v25 }
  0x38   :  { %568 = vmatpush3.bf16.msra.mxu0 %v644_v26 }
  0x39   :  { %596 = vmatpush3.bf16.msra.mxu1 %v645_v27  ;;  %569 = vmatprep.subr.bf16.mxu0 %v646_v28 }
  0x3a   :  { %597 = vmatprep.subr.bf16.mxu1 %v647_v29 }
  0x3c   :  { %570 = vmatpush3.bf16.msra.mxu0 %v648_v30 }
  0x3d   :  { %598 = vmatpush3.bf16.msra.mxu1 %v649_v31 }
  0x3f   :  { %388 = vmatmul.mubr.bf16.vlgmr.msra.gmra.mxu0 %v650_v32 }
  0x40   :  { %437 = vmatmul.mubr.bf16.vlgmr.msra.gmra.mxu1 %v653_v34  ;;  %395 = vmatprep.mubr.bf16.mxu0 %v656_v36 }
  0x41   :  { %444 = vmatprep.mubr.bf16.mxu1 %v658_v37 }
  0x47   :  { %396 = vmatmul.mubr.bf16.gmra.mxu0 %v660_v38 }
  0x48   :  { %445 = vmatmul.mubr.bf16.gmra.mxu1 %v661_v39 }
  0xff   :  { %v571_v40 = vpop.f32.mrf.mxu0 }
 0x100   :  { %v599_v41 = vpop.f32.mrf.mxu1 }
 0x101   :  { %v572_v43 = vpop.f32.mrf.mxu0 }
 0x102   :  { %v573_v44 = vadd.f32 %v572_v43, %v571_v40  ;;  %v600_v45 = vpop.f32.mrf.mxu1 }
 0x103   :  { %v574_v46 = vpop.f32.mrf.mxu0  ;;  %v601_v49 = vadd.f32 %v600_v45, %v599_v41 }
 0x104   :  { %v390_v47 = vadd.f32 %v573_v44, %v495_v42  ;;  %v602_v48 = vpop.f32.mrf.mxu1 }
 0x105   :  { %v575_v50 = vpop.f32.mrf.mxu0 }
 0x106   :  { %v576_v51 = vadd.f32 %v575_v50, %v574_v46  ;;  %v603_v52 = vpop.f32.mrf.mxu1  ;;  %v439_v53 = vadd.f32 %v601_v49, %v390_v47 }
 0x107   :  { %v577_v54 = vpop.f32.mrf.mxu0  ;;  %v604_v56 = vadd.f32 %v603_v52, %v602_v48 }
 0x108   :  { %v393_v55 = vadd.f32 %v576_v51, %v495_v42  ;;  %v605_v57 = vpop.f32.mrf.mxu1  ;;  %662 = vtanh.f32 %v439_v53 }
 0x109   :  { %v578_v58 = vpop.f32.mrf.mxu0 }
 0x10a   :  { %v442_v59 = vadd.f32 %v604_v56, %v393_v55  ;;  %v579_v60 = vadd.f32 %v578_v58, %v577_v54  ;;  %v606_v61 = vpop.f32.mrf.mxu1 }
 0x10b   :  { %v580_v62 = vpop.f32.mrf.mxu0  ;;  %v607_v1 = vadd.f32 %v606_v61, %v605_v57 }
 0x10c   :  { %664 = vtanh.f32 %v442_v59  ;;  %v398_v63 = vadd.f32 %v579_v60, %v495_v42  ;;  %v608_v0 = vpop.f32.mrf.mxu1 }
 0x10d   :  { %v581_v2 = vpop.f32.mrf.mxu0 }
 0x10e   :  { %v582_v3 = vadd.f32 %v581_v2, %v580_v62  ;;  %v609_v4 = vpop.f32.mrf.mxu1  ;;  %v447_v5 = vadd.f32 %v607_v1, %v398_v63 }
 0x10f   :  { %v610_v7 = vadd.f32 %v609_v4, %v608_v0 }
 0x110   :  { %v401_v6 = vadd.f32 %v582_v3, %v495_v42  ;;  %666 = vtanh.f32 %v447_v5 }
 0x112   :  { %v450_v8 = vadd.f32 %v610_v7, %v401_v6 }
 0x114   :  { %668 = vtanh.f32 %v450_v8 }
 0x115   :  { %v663_v9 = vpop.eup %662 }
 0x119   :  { %v665_v10 = vpop.eup %664 }
 0x11a   :  { %v547_v11 = vpack.c.bf16 %v665_v10, %v663_v9 }
 0x11c   :  { %548 = vst [vmem:[#allocation7] sm:$0xff] %v547_v11  }
 0x11d   :  { %v667_v12 = vpop.eup %666 }
 0x121   :  { %v669_v13 = vpop.eup %668 }
 0x122   :  { %v552_v14 = vpack.c.bf16 %v669_v13, %v667_v12 }
 0x124   :  { %554 = vst [vmem:[#allocation7 + $0x8] sm:$0xff] %v552_v14  }
 0x125   :  { %721 = shalt.err (!%p718_p0)
}
 0x126   :  { %488 = dma.vmem_to_hbm [thread:$0]  %s483_s26, 256, %s784_s3, [#allocation4], %s740_s22, %s740_s22, %s741_s23  }
 0x127   :  { %734 = dma.done.wait [#allocation4], 256  }
 0x128   :  { %735 = vsyncadd [#allocation4], 4294967040 }
 0x129   :  { %492 = vsyncpa [#allocation3], 1 }
 0x12a   :  { %493 = vsyncpa [#allocation6], 1 }
 0x12b   :  { %494 = vsyncpa [#allocation4], 1 }

</bundles_post_ra>
